<compile_context>
chip_gen: v7x
topology: tpu7x:2x2x1
jax: 0.10.0
libtpu: 0.0.40
codegen_flags: <defaults>
</compile_context>

<pallas_src>
import jax
import jax.numpy as jnp
from jax.experimental import pallas as pl
from jax.experimental.pallas import tpu as pltpu


# --------------------------------------------------------------------------
# Kernel body
# --------------------------------------------------------------------------
def _make_value_loss_kernel(clip_eps, has_mask, seq_len):
    """Builds the kernel body for a given (clip, mask) configuration."""
    has_old = clip_eps is not None

    def kernel(*refs):
        refs = list(refs)
        values_ref = refs.pop(0)
        old_values_ref = refs.pop(0) if has_old else None
        returns_ref = refs.pop(0)
        mask_ref = refs.pop(0) if has_mask else None
        out_ref = refs.pop(0)
        num_acc = refs.pop(0)
        den_acc = refs.pop(0) if has_mask else None

        t_idx = pl.program_id(1)

        @pl.when(t_idx == 0)
        def _init():
            num_acc[...] = jnp.zeros_like(num_acc)
            if has_mask:
                den_acc[...] = jnp.zeros_like(den_acc)

        # Upcast in-kernel; inputs may arrive as bf16 / bool on the wire.
        v = values_ref[...].astype(jnp.float32)      # [TB, TT]
        r = returns_ref[...].astype(jnp.float32)     # [TB, TT]

        err = v - r
        loss = err * err
        if has_old:
            ov = old_values_ref[...].astype(jnp.float32)
            v_clipped = ov + jnp.clip(v - ov, -clip_eps, clip_eps)
            err_c = v_clipped - r
            loss = jnp.maximum(err_c * err_c, loss)

        if has_mask:
            m = mask_ref[...]
            if m.dtype == jnp.bool_:
                masked_loss = jnp.where(m, loss, 0.0)
                mf = jnp.where(m, 1.0, 0.0).astype(jnp.float32)
            else:
                mf = m.astype(jnp.float32)
                masked_loss = loss * mf
            num_acc[...] += jnp.sum(masked_loss, axis=-1, keepdims=True)
            den_acc[...] += jnp.sum(mf, axis=-1, keepdims=True)
        else:
            num_acc[...] += jnp.sum(loss, axis=-1, keepdims=True)

        @pl.when(t_idx == pl.num_programs(1) - 1)
        def _finalize():
            if has_mask:
                # One divide per row per batch tile; exact division keeps
                # parity with the reference.  den == 0 -> NaN/Inf as in torch.
                out_ref[...] = num_acc[...] / den_acc[...]
            else:
                out_ref[...] = num_acc[...] * jnp.float32(1.0 / seq_len)

    return kernel


# --------------------------------------------------------------------------
# Tile selection (per-generation VMEM budget)
# --------------------------------------------------------------------------
_MAX_TB = 512
_MAX_TT = 4096


def _vmem_capacity_bytes():
    """Physical VMEM of the current chip; conservative fallback = v7x (64 MiB)."""
    try:
        info = pltpu.get_tpu_info()
        for attr in ("vmem_capacity_bytes", "vmem_bytes"):
            cap = getattr(info, attr, None)
            if cap:
                return int(cap)
    except Exception:
        pass
    return 64 << 20


def _tile_candidates(dim, unit, cap):
    """Legal block sizes along one dim: multiples of `unit` that evenly divide
    `dim` (capped at `cap`), plus the full dim (always legal).  Descending."""
    cands = {c for c in range(unit, min(dim, cap) + 1, unit) if dim % c == 0}
    cands.add(dim)
    return sorted(cands, reverse=True)


def _select_tiles(b, t, per_elem_bytes, budget_bytes):
    """Largest (tb, tt) whose double-buffered input footprint fits the budget."""
    tb_cands = _tile_candidates(b, 8, _MAX_TB)
    # Megacore: keep >= 2 steps along the "parallel" batch axis when possible
    # so v7x's second TensorCore gets work (no-op on single-TC v5e/v6e).
    if b >= 16:
        halved = [c for c in tb_cands if c <= b // 2]
        if halved:
            tb_cands = halved
    tt_cands = _tile_candidates(t, 128, _MAX_TT)

    best = None
    for tb in tb_cands:
        for tt in tt_cands:
            fp = 2 * tb * tt * per_elem_bytes   # double-buffered inputs
            if fp <= budget_bytes:
                key = (tb * tt, tt)             # prefer biggest tile, lane-wide
                if best is None or key > best[0]:
                    best = (key, tb, tt)
    if best is None:
        # Pathological non-divisible huge dims: take the smallest legal block
        # and rely on the explicit vmem_limit below (capped at physical VMEM).
        # TODO(synk): pad T/B to tileable sizes for truly ragged huge shapes.
        return min(tb_cands), min(tt_cands)
    return best[1], best[2]


# --------------------------------------------------------------------------
# Wrapper
# --------------------------------------------------------------------------
def value_loss(values, old_values, returns, action_mask=None, clip_eps=None,
               tile_b=None, tile_t=None):
    """Pallas TPU implementation of ValueLoss.forward. Returns a scalar f32."""
    values = jnp.asarray(values)
    returns = jnp.asarray(returns)
    assert values.ndim == 2, "expected [batch, seq] inputs"
    b, t = values.shape

    has_mask = action_mask is not None
    has_old = clip_eps is not None

    operands = [values]
    if has_old:
        operands.append(jnp.asarray(old_values))
    operands.append(returns)
    if has_mask:
        # Pass the mask in its native dtype: bool lowers as 1 byte on the wire
        # and is consumed directly in-kernel (no wrapper-side astype HBM pass).
        operands.append(jnp.asarray(action_mask))

    per_elem_bytes = sum(op.dtype.itemsize for op in operands)

    cap = _vmem_capacity_bytes()
    budget = min(int(cap * 0.6), 80 << 20)   # ~38 MiB on v7x, ~77 MiB v5e/v6e
    tb, tt = _select_tiles(b, t, per_elem_bytes, budget)
    if tile_b is not None:
        tb = tile_b
    if tile_t is not None:
        tt = tile_t
    assert b % tb == 0 and t % tt == 0, (b, t, tb, tt)
    nb, nt = b // tb, t // tt

    data_spec = pl.BlockSpec((tb, tt), lambda i, j: (i, j))
    in_specs = [data_spec] * len(operands)
    out_spec = pl.BlockSpec((tb, 1), lambda i, j: (i, 0))

    scratch_shapes = [pltpu.VMEM((tb, 1), jnp.float32)]      # numerator
    if has_mask:
        scratch_shapes.append(pltpu.VMEM((tb, 1), jnp.float32))  # denominator

    # Explicit VMEM limit: double-buffered inputs + (lane-padded) out/scratch
    # + margin, never above the physical capacity.
    input_fp = 2 * tb * tt * per_elem_bytes
    small_fp = (2 + len(scratch_shapes)) * tb * 128 * 4 * 2
    vmem_limit = int(input_fp + small_fp + (2 << 20))
    vmem_limit = max(vmem_limit, 16 << 20)
    vmem_limit = min(vmem_limit, cap - (4 << 20))

    flops_per_elem = 12 if has_old else 4
    cost = pl.CostEstimate(
        flops=flops_per_elem * b * t,
        transcendentals=0,
        bytes_accessed=sum(int(op.size) * op.dtype.itemsize for op in operands)
        + b * 4,
    )

    kernel = _make_value_loss_kernel(clip_eps, has_mask, t)

    per_row = pl.pallas_call(
        kernel,
        out_shape=jax.ShapeDtypeStruct((b, 1), jnp.float32),
        grid_spec=pltpu.PrefetchScalarGridSpec(
            num_scalar_prefetch=0,
            grid=(nb, nt),
            in_specs=in_specs,
            out_specs=out_spec,
            scratch_shapes=scratch_shapes,
        ),
        compiler_params=pltpu.CompilerParams(
            dimension_semantics=("parallel", "arbitrary"),
            vmem_limit_bytes=vmem_limit,
        ),
        cost_estimate=cost,
    )(*operands)

    # Tiny epilogue: mean over batch rows and the 0.5 factor (B floats).
    return 0.5 * jnp.mean(per_row)


# --------------------------------------------------------------------------
# Pure-JAX reference (mirrors the PyTorch code, computed in f32)
# --------------------------------------------------------------------------
def _reference(values, old_values, returns, action_mask, clip_eps):
    values = jnp.asarray(values).astype(jnp.float32)
    returns = jnp.asarray(returns).astype(jnp.float32)
    if clip_eps is not None:
        old_values = jnp.asarray(old_values).astype(jnp.float32)
        v_clipped = old_values + jnp.clip(values - old_values, -clip_eps, clip_eps)
        loss = jnp.maximum((v_clipped - returns) ** 2, (values - returns) ** 2)
    else:
        loss = (values - returns) ** 2
    if action_mask is None:
        row = loss.mean(axis=-1)
    else:
        m = jnp.asarray(action_mask).astype(jnp.float32)
        row = (loss * m).sum(axis=-1) / m.sum(axis=-1)
    return 0.5 * row.mean()


if __name__ == "__main__":
    key = jax.random.PRNGKey(0)

    # ---- Test 1: f32, bool mask, clip (single-tile path) ----
    B, T = 2, 8
    k1, k2, k3, k4 = jax.random.split(key, 4)
    v = jax.random.normal(k1, (B, T), jnp.float32)
    ov = jax.random.normal(k2, (B, T), jnp.float32)
    r = jax.random.normal(k3, (B, T), jnp.float32)
    mask = (jax.random.uniform(k4, (B, T)) > 0.3)
    mask = mask.at[:, 0].set(True)  # keep at least one valid token per row

    out = jax.block_until_ready(value_loss(v, ov, r, mask, clip_eps=0.2))
    ref = _reference(v, ov, r, mask, 0.2)
    assert jnp.allclose(out, ref, rtol=1e-5, atol=1e-6), (out, ref)

    # ---- Test 2: f32, no mask, no clip (old_values & mask not DMA'd) ----
    out = jax.block_until_ready(value_loss(v, ov, r, None, clip_eps=None))
    ref = _reference(v, ov, r, None, None)
    assert jnp.allclose(out, ref, rtol=1e-5, atol=1e-6), (out, ref)

    # ---- Test 3: f32, bool mask, no clip ----
    out = jax.block_until_ready(value_loss(v, None, r, mask, clip_eps=None))
    ref = _reference(v, None, r, mask, None)
    assert jnp.allclose(out, ref, rtol=1e-5, atol=1e-6), (out, ref)

    # ---- Test 4: bf16 inputs, bool mask, clip; forced multi-tile seq axis ----
    B, T = 8, 384  # tile_t=128 -> 3 seq steps: exercises init/accumulate/finalize
    k1, k2, k3, k4 = jax.random.split(jax.random.PRNGKey(1), 4)
    v = jax.random.normal(k1, (B, T), jnp.float32).astype(jnp.bfloat16)
    ov = jax.random.normal(k2, (B, T), jnp.float32).astype(jnp.bfloat16)
    r = jax.random.normal(k3, (B, T), jnp.float32).astype(jnp.bfloat16)
    mask = (jax.random.uniform(k4, (B, T)) > 0.3)
    mask = mask.at[:, 0].set(True)

    out = jax.block_until_ready(value_loss(v, ov, r, mask, clip_eps=0.2,
                                           tile_t=128))
    ref = _reference(v, ov, r, mask, 0.2)
    assert jnp.allclose(out, ref, rtol=2e-3, atol=2e-3), (out, ref)

    # ---- Test 5: f32, mask, clip; multiple batch tiles AND seq tiles ----
    B, T = 64, 256
    k1, k2, k3, k4 = jax.random.split(jax.random.PRNGKey(2), 4)
    v = jax.random.normal(k1, (B, T), jnp.float32)
    ov = jax.random.normal(k2, (B, T), jnp.float32)
    r = jax.random.normal(k3, (B, T), jnp.float32)
    mask = (jax.random.uniform(k4, (B, T)) > 0.3)
    mask = mask.at[:, 0].set(True)

    out = jax.block_until_ready(value_loss(v, ov, r, mask, clip_eps=0.2,
                                           tile_b=16, tile_t=128))
    ref = _reference(v, ov, r, mask, 0.2)
    assert jnp.allclose(out, ref, rtol=1e-5, atol=1e-6), (out, ref)

    print("KERNEL_OK")
</pallas_src>

<mosaic_0001>
module attributes {stable_mosaic.version = 11 : i64} {
  func.func @kernel(%arg0: i32, %arg1: i32, %arg2: memref<2x8xf32, #tpu.memory_space<vmem>>, %arg3: memref<2x8xf32, #tpu.memory_space<vmem>>, %arg4: memref<2x8xf32, #tpu.memory_space<vmem>>, %arg5: memref<2x8xi32, #tpu.memory_space<vmem>>, %arg6: memref<2x1xf32, #tpu.memory_space<vmem>>, %arg7: memref<2x1xf32, #tpu.memory_space<vmem>>, %arg8: memref<2x1xf32, #tpu.memory_space<vmem>>) attributes {dimension_semantics = [#tpu.dimension_semantics<parallel>, #tpu.dimension_semantics<arbitrary>], iteration_bounds = array<i64: 1, 1>, scalar_prefetch = 0 : i64, scratch_operands = 2 : i64, tpu.core_type = #tpu.core_type<tc>, window_params = [{transform_indices = @transform_0, window_bounds = array<i64: 2, 8>}, {transform_indices = @transform_1, window_bounds = array<i64: 2, 8>}, {transform_indices = @transform_2, window_bounds = array<i64: 2, 8>}, {transform_indices = @transform_3, window_bounds = array<i64: 2, 8>}, {transform_indices = @transform_4, window_bounds = array<i64: 2, 1>}]} {
    %c0_i32 = arith.constant 0 : i32
    %0 = arith.cmpi eq, %arg1, %c0_i32 : i32
    %1 = arith.extui %0 : i1 to i32
    %c0_i32_0 = arith.constant 0 : i32
    %2 = arith.cmpi ne, %1, %c0_i32_0 : i32
    scf.if %2 {
      %cst_25 = arith.constant 0.000000e+00 : f32
      %37 = vector.broadcast %cst_25 : f32 to vector<2x1xf32>
      %c0_26 = arith.constant 0 : index
      %c0_27 = arith.constant 0 : index
      %38 = vector.load %arg7[%c0_26, %c0_27] : memref<2x1xf32, #tpu.memory_space<vmem>>, vector<2x1xf32>
      tpu.vector_store %arg7[%c0_26, %c0_27], %37 {strides = array<i32>} : memref<2x1xf32, #tpu.memory_space<vmem>>, vector<2x1xf32>,
      %cst_28 = arith.constant 0.000000e+00 : f32
      %39 = vector.broadcast %cst_28 : f32 to vector<2x1xf32>
      %c0_29 = arith.constant 0 : index
      %c0_30 = arith.constant 0 : index
      %40 = vector.load %arg8[%c0_29, %c0_30] : memref<2x1xf32, #tpu.memory_space<vmem>>, vector<2x1xf32>
      tpu.vector_store %arg8[%c0_29, %c0_30], %39 {strides = array<i32>} : memref<2x1xf32, #tpu.memory_space<vmem>>, vector<2x1xf32>,
    } else {
    }
    %c0 = arith.constant 0 : index
    %c0_1 = arith.constant 0 : index
    %3 = vector.load %arg2[%c0, %c0_1] : memref<2x8xf32, #tpu.memory_space<vmem>>, vector<2x8xf32>
    %c0_2 = arith.constant 0 : index
    %c0_3 = arith.constant 0 : index
    %4 = vector.load %arg4[%c0_2, %c0_3] : memref<2x8xf32, #tpu.memory_space<vmem>>, vector<2x8xf32>
    %5 = arith.subf %3, %4 : vector<2x8xf32>
    %6 = arith.mulf %5, %5 : vector<2x8xf32>
    %c0_4 = arith.constant 0 : index
    %c0_5 = arith.constant 0 : index
    %7 = vector.load %arg3[%c0_4, %c0_5] : memref<2x8xf32, #tpu.memory_space<vmem>>, vector<2x8xf32>
    %8 = arith.subf %3, %7 : vector<2x8xf32>
    %cst = arith.constant -2.000000e-01 : f32
    %cst_6 = arith.constant 2.000000e-01 : f32
    %9 = vector.broadcast %cst : f32 to vector<2x8xf32>
    %10 = arith.maximumf %9, %8 : vector<2x8xf32>
    %11 = vector.broadcast %cst_6 : f32 to vector<2x8xf32>
    %12 = arith.minimumf %11, %10 : vector<2x8xf32>
    %13 = arith.addf %7, %12 : vector<2x8xf32>
    %14 = arith.subf %13, %4 : vector<2x8xf32>
    %15 = arith.mulf %14, %14 : vector<2x8xf32>
    %16 = arith.maximumf %15, %6 : vector<2x8xf32>
    %c0_7 = arith.constant 0 : index
    %c0_8 = arith.constant 0 : index
    %17 = vector.load %arg5[%c0_7, %c0_8] : memref<2x8xi32, #tpu.memory_space<vmem>>, vector<2x8xi32>
    %cst_9 = arith.constant dense<0> : vector<2x8xi32>
    %18 = arith.cmpi ne, %17, %cst_9 : vector<2x8xi32>
    %cst_10 = arith.constant 0.000000e+00 : f32
    %19 = vector.broadcast %cst_10 : f32 to vector<2x8xf32>
    %20 = arith.select %18, %16, %19 : vector<2x8xi1>, vector<2x8xf32>
    %cst_11 = arith.constant 1.000000e+00 : f32
    %cst_12 = arith.constant 0.000000e+00 : f32
    %21 = vector.broadcast %cst_11 : f32 to vector<2x8xf32>
    %22 = vector.broadcast %cst_12 : f32 to vector<2x8xf32>
    %23 = arith.select %18, %21, %22 : vector<2x8xi1>, vector<2x8xf32>
    %c0_13 = arith.constant 0 : index
    %c0_14 = arith.constant 0 : index
    %24 = vector.load %arg7[%c0_13, %c0_14] : memref<2x1xf32, #tpu.memory_space<vmem>>, vector<2x1xf32>
    %cst_15 = arith.constant dense<0.000000e+00> : vector<2xf32>
    %25 = vector.multi_reduction <add>, %20, %cst_15 [1] : vector<2x8xf32> to vector<2xf32>
    %26 = vector.shape_cast %25 : vector<2xf32> to vector<2x1xf32>
    %27 = arith.addf %24, %26 : vector<2x1xf32>
    %c0_16 = arith.constant 0 : index
    %c0_17 = arith.constant 0 : index
    %28 = vector.load %arg7[%c0_16, %c0_17] : memref<2x1xf32, #tpu.memory_space<vmem>>, vector<2x1xf32>
    tpu.vector_store %arg7[%c0_16, %c0_17], %27 {strides = array<i32>} : memref<2x1xf32, #tpu.memory_space<vmem>>, vector<2x1xf32>,
    %c0_18 = arith.constant 0 : index
    %c0_19 = arith.constant 0 : index
    %29 = vector.load %arg8[%c0_18, %c0_19] : memref<2x1xf32, #tpu.memory_space<vmem>>, vector<2x1xf32>
    %cst_20 = arith.constant dense<0.000000e+00> : vector<2xf32>
    %30 = vector.multi_reduction <add>, %23, %cst_20 [1] : vector<2x8xf32> to vector<2xf32>
    %31 = vector.shape_cast %30 : vector<2xf32> to vector<2x1xf32>
    %32 = arith.addf %29, %31 : vector<2x1xf32>
    %c0_21 = arith.constant 0 : index
    %c0_22 = arith.constant 0 : index
    %33 = vector.load %arg8[%c0_21, %c0_22] : memref<2x1xf32, #tpu.memory_space<vmem>>, vector<2x1xf32>
    tpu.vector_store %arg8[%c0_21, %c0_22], %32 {strides = array<i32>} : memref<2x1xf32, #tpu.memory_space<vmem>>, vector<2x1xf32>,
    %c0_i32_23 = arith.constant 0 : i32
    %34 = arith.cmpi eq, %arg1, %c0_i32_23 : i32
    %35 = arith.extui %34 : i1 to i32
    %c0_i32_24 = arith.constant 0 : i32
    %36 = arith.cmpi ne, %35, %c0_i32_24 : i32
    scf.if %36 {
      %c0_25 = arith.constant 0 : index
      %c0_26 = arith.constant 0 : index
      %37 = vector.load %arg7[%c0_25, %c0_26] : memref<2x1xf32, #tpu.memory_space<vmem>>, vector<2x1xf32>
      %c0_27 = arith.constant 0 : index
      %c0_28 = arith.constant 0 : index
      %38 = vector.load %arg8[%c0_27, %c0_28] : memref<2x1xf32, #tpu.memory_space<vmem>>, vector<2x1xf32>
      %39 = arith.divf %37, %38 : vector<2x1xf32>
      %c0_29 = arith.constant 0 : index
      %c0_30 = arith.constant 0 : index
      %40 = vector.load %arg6[%c0_29, %c0_30] : memref<2x1xf32, #tpu.memory_space<vmem>>, vector<2x1xf32>
      tpu.vector_store %arg6[%c0_29, %c0_30], %39 {strides = array<i32>} : memref<2x1xf32, #tpu.memory_space<vmem>>, vector<2x1xf32>,
    } else {
    }
    return
  }
  func.func @transform_0(%arg0: i32, %arg1: i32) -> (i32, i32) {
    %c0_i32 = arith.constant 0 : i32
    return %arg0, %arg1 : i32, i32
  }
  func.func @transform_1(%arg0: i32, %arg1: i32) -> (i32, i32) {
    %c0_i32 = arith.constant 0 : i32
    return %arg0, %arg1 : i32, i32
  }
  func.func @transform_2(%arg0: i32, %arg1: i32) -> (i32, i32) {
    %c0_i32 = arith.constant 0 : i32
    return %arg0, %arg1 : i32, i32
  }
  func.func @transform_3(%arg0: i32, %arg1: i32) -> (i32, i32) {
    %c0_i32 = arith.constant 0 : i32
    return %arg0, %arg1 : i32, i32
  }
  func.func @transform_4(%arg0: i32, %arg1: i32) -> (i32, i32) {
    %c0_i32 = arith.constant 0 : i32
    %c0_i32_0 = arith.constant 0 : i32
    return %arg0, %c0_i32 : i32, i32
  }
}

</mosaic_0001>

<bundles_post_ra>
// kernel: tpu_custom_call.1
= control target key start
LH: loop header
LB: loop body
LE: loop exit
PB: predicated region body
PF: predicated region fallthrough
CT: control target
= control target key end

     0   :  { %vm21_vm0 = vcmask 1024   ;;  %v70_v0 = vmov 0.0   ;;  %vm41_vm1 = vcmask 58368   ;;  %s118_s3 = inlined_call_operand.vmem [shape: s32[2,8], index: 3, kind: input, shape index: {}]   ;;  %s119_s0 = inlined_call_operand.vmem [shape: f32[2,8], index: 0, kind: input, shape index: {}]   ;;  %s120_s1 = inlined_call_operand.vmem [shape: f32[2,8], index: 1, kind: input, shape index: {}]   ;;  %s121_s2 = inlined_call_operand.vmem [shape: f32[2,8], index: 2, kind: input, shape index: {}]   ;;  %s122_s4 = inlined_call_operand.vmem [shape: f32[2,1], index: 4, kind: output, shape index: {}]  }
   0x1   :  { %22 = vst.msk [vmem:[#allocation2] sm:$0x3] %vm21_vm0, %v70_v0  ;;  %23 = vst.msk [vmem:[#allocation3] sm:$0x3] %vm21_vm0, %v70_v0  ;;  %v36_v1 = vld [vmem:[%s118_s3] sm:$0x3] }
   0x2   :  { %v24_v2 = vld [vmem:[%s119_s0] sm:$0x3]  ;;  %vm37_vm2 = vcmp.ne.s32.totalorder %v36_v1, 0 }
   0x3   :  { %v25_v3 = vld [vmem:[%s121_s2] sm:$0x3]  ;;  %v39_v5 = vsel %vm37_vm2, 1.0, %v70_v0 }
   0x4   :  { %v28_v4 = vld [vmem:[%s120_s1] sm:$0x3]  ;;  %v49_v7 = vsel %vm41_vm1, %v39_v5, 0.0  ;;  %v26_v8 = vsub.f32 %v24_v2, %v25_v3 }
   0x5   :  { %v29_v6 = vsub.f32 %v24_v2, %v28_v4  ;;  %50 = vadd.xlane.f32.xlu0 %v49_v7 }
   0x6   :  { %v27_v11 = vmul.f32 %v26_v8, %v26_v8 }
   0x7   :  { %v66_v9 = vclamps-f32 %v29_v6, 0.2 }
   0x8   :  { %v48_v17 = vld [vmem:[#allocation3] sm:$0x3]  ;;  %v40_v21 = vld [vmem:[#allocation2] sm:$0x3] }
   0x9   :  { %v32_v10 = vadd.f32 %v66_v9, %v28_v4 }
   0xb   :  { %v33_v12 = vsub.f32 %v32_v10, %v25_v3 }
   0xd   :  { %v34_v13 = vmul.f32 %v33_v12, %v33_v12 }
   0xf   :  { %v35_v14 = vmax.f32 %v34_v13, %v27_v11 }
  0x11   :  { %v38_v15 = vsel %vm37_vm2, %v35_v14, 0.0 }
  0x12   :  { %v42_v16 = vsel %vm41_vm1, %v38_v15, 0.0 }
  0x13   :  { %43 = vadd.xlane.f32.xlu0 %v42_v16 }
  0x92   :  { %v51_v18 = vpop.xlane.xlu0 %50 }
  0x93   :  { %v52_v19 = vadd.f32 %v51_v18, %v48_v17 }
  0x95   :  { %53 = vst.msk [vmem:[#allocation3] sm:$0x3] %vm21_vm0, %v52_v19 }
  0x9c   :  { %v58_v20 = vld [vmem:[#allocation3] sm:$0x3] }
  0x9d   :  { %68 = vrcp.f32 %v58_v20 }
  0xa0   :  { %v44_v22 = vpop.xlane.xlu0 %43 }
  0xa1   :  { %v45_v23 = vadd.f32 %v44_v22, %v40_v21 }
  0xa3   :  { %47 = vst.msk [vmem:[#allocation2] sm:$0x3] %vm21_vm0, %v45_v23 }
  0xa7   :  { %v69_v24 = vpop.eup %68 }
  0xaa   :  { %v57_v25 = vld [vmem:[#allocation2] sm:$0x3] }
  0xab   :  { %v60_v26 = vmul.f32 %v69_v24, %v57_v25 }
  0xad   :  { %61 = vst.msk [vmem:[%s122_s4] sm:$0x3] %vm21_vm0, %v60_v26 }

</bundles_post_ra>
